<compile_context>
chip_gen: v5e
topology: v5e:2x2
jax: 0.10.0
libtpu: 0.0.40
codegen_flags: <defaults>
</compile_context>

<pallas_src>
import jax
import jax.numpy as jnp
from jax import lax
from jax.experimental import pallas as pl
from jax.experimental.pallas import tpu as pltpu

DEPTH = 3          # ParNet "depth" argument -> number of Linear layers
UNITS = 32         # hidden width
PREDS = 1          # output width (squeezed away)


def _parnet_kernel(x_ref, w0_ref, b0_ref, w1_ref, b1_ref, w2t_ref, b2_ref, o_ref):
    # act_fn == relu (DIMES default); applied after every layer except the last,
    # matching MLP.forward.  Matmul dtype is whatever the wrapper cast the
    # weights to (bf16 by default); bias + ReLU + accumulation stay f32.
    mm_dtype = w0_ref.dtype

    x = x_ref[...].astype(mm_dtype)                         # (tile, UNITS)

    # Layer 0: contract UNITS of both operands -> transposed activation
    # (UNITS, tile); the layout change happens on-chip (MXU/XLU), not in HBM.
    h = lax.dot_general(w0_ref[...], x,
                        dimension_numbers=(((1,), (1,)), ((), ())),
                        preferred_element_type=jnp.float32) + b0_ref[...]
    h = jnp.maximum(h, 0.0)

    # Layer 1: standard (UNITS,UNITS) @ (UNITS,tile).
    h = jnp.dot(w1_ref[...], h.astype(mm_dtype),
                preferred_element_type=jnp.float32) + b1_ref[...]
    h = jnp.maximum(h, 0.0)

    # Layer 2 (out width 1): VPU broadcast-multiply + XLU sublane reduce —
    # keeps the saturating MXU/vex slot free of a 0.4%-utilization matmul.
    out = jnp.sum(w2t_ref[...] * h, axis=0, keepdims=True) + b2_ref[...]   # (1, tile)
    o_ref[...] = out.astype(o_ref.dtype)                                   # lane-dense


def parnet_forward(x, params, *, tile_n=16384, matmul_dtype=jnp.bfloat16):
    """x: (N, UNITS) float32 (natural PyTorch layout).
    params: [(W (out,in), b (out,1)), ...] in native PyTorch layout.

    Returns (N,) float32 — ParNet.forward output (preds=1 squeezed away).
    matmul_dtype=jnp.float32 gives bit-faithful f32 matmuls (slower MXU path).
    """
    (w0, b0), (w1, b1), (w2, b2) = params
    N, U = x.shape
    assert U == UNITS

    # One-off tiny weight prep (a few KB, not a pass over x):
    w0m = w0.astype(matmul_dtype)
    w1m = w1.astype(matmul_dtype)
    w2t = jnp.transpose(w2)            # (UNITS, PREDS): broadcast column for VPU path

    # Tile selection: lane-granular, capped by tile_n, and capped so the grid
    # has >= 2 steps whenever possible (v7x: shard across both TensorCores).
    n_lane = ((N + 127) // 128) * 128
    tile = max(128, (tile_n // 128) * 128)
    if n_lane >= 256:
        half = ((pl.cdiv(n_lane, 2) + 127) // 128) * 128
        tile = min(tile, half)
    tile = min(tile, n_lane)
    grid = (pl.cdiv(N, tile),)

    def row_map(i):                    # x tiles walk the row axis
        return (i, 0)

    def col_map(i):                    # (1, tile) output tiles walk the lane axis
        return (0, i)

    def rep_map(i):                    # constant block index -> no per-step re-DMA
        return (0, 0)

    wbytes = lambda a: int(a.size) * jnp.dtype(a.dtype).itemsize
    flops = 2 * N * (UNITS * UNITS * (DEPTH - 1) + UNITS * PREDS)
    bytes_accessed = (N * UNITS * 4 + N * PREDS * 4
                      + sum(wbytes(a) for a in (w0m, b0, w1m, b1, w2t, b2)))

    out = pl.pallas_call(
        _parnet_kernel,
        out_shape=jax.ShapeDtypeStruct((PREDS, N), jnp.float32),
        grid_spec=pltpu.PrefetchScalarGridSpec(
            num_scalar_prefetch=0,
            grid=grid,
            in_specs=[
                pl.BlockSpec((tile, UNITS), row_map),      # x tile, natural layout
                pl.BlockSpec((UNITS, UNITS), rep_map),     # W0 (out, in)
                pl.BlockSpec((UNITS, 1), rep_map),         # b0 (out, 1)
                pl.BlockSpec((UNITS, UNITS), rep_map),     # W1
                pl.BlockSpec((UNITS, 1), rep_map),         # b1
                pl.BlockSpec((UNITS, PREDS), rep_map),     # W2^T (UNITS, 1)
                pl.BlockSpec((PREDS, 1), rep_map),         # b2 (1, 1)
            ],
            out_specs=pl.BlockSpec((PREDS, tile), col_map),    # lane-dense (1, tile)
        ),
        compiler_params=pltpu.CompilerParams(
            dimension_semantics=("parallel",),       # shards grid across TCs on v7x
            vmem_limit_bytes=48 * 1024 * 1024),      # raise v5e's 16 MiB default
        cost_estimate=pl.CostEstimate(
            flops=flops, transcendentals=0, bytes_accessed=bytes_accessed),
    )(x, w0m, b0, w1m, b1, w2t, b2)

    # ParNet.forward: super().forward(x).squeeze(dim=-1)  (glue, outside kernel)
    return out.reshape(N)


def init_parnet_params(key):
    """Deterministic init mimicking torch.nn.Linear default U(-1/sqrt(in), 1/sqrt(in)).

    Weights kept in native PyTorch (out, in) layout; biases stored as (out, 1)
    columns so they broadcast across the lane (row) axis inside the kernel.
    """
    units_list = [UNITS] * DEPTH + [PREDS]   # [32, 32, 32, 1] for DEPTH=3
    params = []
    for i in range(len(units_list) - 1):
        fan_in, fan_out = units_list[i], units_list[i + 1]
        key, kw, kb = jax.random.split(key, 3)
        bound = 1.0 / (fan_in ** 0.5)
        w = jax.random.uniform(kw, (fan_out, fan_in), jnp.float32, -bound, bound)
        b = jax.random.uniform(kb, (fan_out, 1), jnp.float32, -bound, bound)
        params.append((w, b))
    return params


def parnet_reference(x, params):
    h = x
    for i, (w, b) in enumerate(params):
        h = h @ w.T + b.reshape(1, -1)
        if i < len(params) - 1:
            h = jnp.maximum(h, 0.0)
    return jnp.squeeze(h, axis=-1)


if __name__ == "__main__":
    key = jax.random.PRNGKey(0)
    key, kx1, kx2 = jax.random.split(key, 3)
    params = init_parnet_params(key)

    # Small shapes consistent with the module (N candidate edges, hidden=32).
    # N=1000 exercises the ragged (partial last block) path; both exercise
    # the >=2-step grid.
    for N, kx in ((256, kx1), (1000, kx2)):
        x = jax.random.normal(kx, (N, UNITS), jnp.float32)
        y_ref = parnet_reference(x, params)

        # Default path: bf16 MXU passes, f32 accumulate/bias/relu.
        y_bf16 = jax.block_until_ready(parnet_forward(x, params))
        assert y_bf16.shape == (N,)
        assert jnp.allclose(y_bf16, y_ref, atol=5e-2, rtol=5e-2), \
            float(jnp.max(jnp.abs(y_bf16 - y_ref)))

        # Full-f32 path: tight semantic check of the same kernel.
        y_f32 = jax.block_until_ready(
            parnet_forward(x, params, matmul_dtype=jnp.float32))
        assert y_f32.shape == (N,)
        assert jnp.allclose(y_f32, y_ref, atol=1e-4, rtol=1e-4), \
            float(jnp.max(jnp.abs(y_f32 - y_ref)))

    print("KERNEL_OK")
</pallas_src>

<mosaic_0001>
module attributes {stable_mosaic.version = 11 : i64} {
  func.func @_parnet_kernel(%arg0: i32, %arg1: memref<128x32xf32, #tpu.memory_space<vmem>>, %arg2: memref<32x32xbf16, #tpu.memory_space<vmem>>, %arg3: memref<32x1xf32, #tpu.memory_space<vmem>>, %arg4: memref<32x32xbf16, #tpu.memory_space<vmem>>, %arg5: memref<32x1xf32, #tpu.memory_space<vmem>>, %arg6: memref<32x1xf32, #tpu.memory_space<vmem>>, %arg7: memref<1x1xf32, #tpu.memory_space<vmem>>, %arg8: memref<1x128xf32, #tpu.memory_space<vmem>>) attributes {dimension_semantics = [#tpu.dimension_semantics<parallel>], iteration_bounds = array<i64: 2>, scalar_prefetch = 0 : i64, scratch_operands = 0 : i64, tpu.core_type = #tpu.core_type<tc>, window_params = [{transform_indices = @transform_0, window_bounds = array<i64: 128, 32>}, {pipeline_mode = #tpu.pipeline_mode<synchronous>, transform_indices = @transform_1, window_bounds = array<i64: 32, 32>}, {pipeline_mode = #tpu.pipeline_mode<synchronous>, transform_indices = @transform_2, window_bounds = array<i64: 32, 1>}, {pipeline_mode = #tpu.pipeline_mode<synchronous>, transform_indices = @transform_3, window_bounds = array<i64: 32, 32>}, {pipeline_mode = #tpu.pipeline_mode<synchronous>, transform_indices = @transform_4, window_bounds = array<i64: 32, 1>}, {pipeline_mode = #tpu.pipeline_mode<synchronous>, transform_indices = @transform_5, window_bounds = array<i64: 32, 1>}, {pipeline_mode = #tpu.pipeline_mode<synchronous>, transform_indices = @transform_6, window_bounds = array<i64: 1, 1>}, {transform_indices = @transform_7, window_bounds = array<i64: 1, 128>}]} {
    %c0 = arith.constant 0 : index
    %c0_0 = arith.constant 0 : index
    %0 = vector.load %arg1[%c0, %c0_0] : memref<128x32xf32, #tpu.memory_space<vmem>>, vector<128x32xf32>
    %1 = arith.truncf %0 : vector<128x32xf32> to vector<128x32xbf16>
    %c0_1 = arith.constant 0 : index
    %c0_2 = arith.constant 0 : index
    %2 = vector.load %arg2[%c0_1, %c0_2] : memref<32x32xbf16, #tpu.memory_space<vmem>>, vector<32x32xbf16>
    %cst = arith.constant dense<0.000000e+00> : vector<32x128xf32>
    %3 = tpu.matmul %2, %1, %cst {dimension_numbers = #tpu.dot_dimension_numbers<[1], [1], [0], [0], [0, 0, 1, 0], [], []>} : vector<32x32xbf16>, vector<128x32xbf16>, vector<32x128xf32> -> vector<32x128xf32>
    %c0_3 = arith.constant 0 : index
    %c0_4 = arith.constant 0 : index
    %4 = vector.load %arg3[%c0_3, %c0_4] : memref<32x1xf32, #tpu.memory_space<vmem>>, vector<32x1xf32>
    %5 = vector.broadcast %4 : vector<32x1xf32> to vector<32x128xf32>
    %6 = arith.addf %3, %5 : vector<32x128xf32>
    %cst_5 = arith.constant 0.000000e+00 : f32
    %7 = vector.broadcast %cst_5 : f32 to vector<32x128xf32>
    %8 = arith.maximumf %6, %7 : vector<32x128xf32>
    %c0_6 = arith.constant 0 : index
    %c0_7 = arith.constant 0 : index
    %9 = vector.load %arg4[%c0_6, %c0_7] : memref<32x32xbf16, #tpu.memory_space<vmem>>, vector<32x32xbf16>
    %10 = arith.truncf %8 : vector<32x128xf32> to vector<32x128xbf16>
    %cst_8 = arith.constant dense<0.000000e+00> : vector<32x128xf32>
    %11 = tpu.matmul %9, %10, %cst_8 {dimension_numbers = #tpu.dot_dimension_numbers<[1], [0], [0], [1], [0, 0, 1, 1], [], []>} : vector<32x32xbf16>, vector<32x128xbf16>, vector<32x128xf32> -> vector<32x128xf32>
    %c0_9 = arith.constant 0 : index
    %c0_10 = arith.constant 0 : index
    %12 = vector.load %arg5[%c0_9, %c0_10] : memref<32x1xf32, #tpu.memory_space<vmem>>, vector<32x1xf32>
    %13 = vector.broadcast %12 : vector<32x1xf32> to vector<32x128xf32>
    %14 = arith.addf %11, %13 : vector<32x128xf32>
    %cst_11 = arith.constant 0.000000e+00 : f32
    %15 = vector.broadcast %cst_11 : f32 to vector<32x128xf32>
    %16 = arith.maximumf %14, %15 : vector<32x128xf32>
    %c0_12 = arith.constant 0 : index
    %c0_13 = arith.constant 0 : index
    %17 = vector.load %arg6[%c0_12, %c0_13] : memref<32x1xf32, #tpu.memory_space<vmem>>, vector<32x1xf32>
    %18 = vector.broadcast %17 : vector<32x1xf32> to vector<32x128xf32>
    %19 = arith.mulf %18, %16 : vector<32x128xf32>
    %cst_14 = arith.constant dense<0.000000e+00> : vector<128xf32>
    %20 = vector.multi_reduction <add>, %19, %cst_14 [0] : vector<32x128xf32> to vector<128xf32>
    %21 = vector.shape_cast %20 : vector<128xf32> to vector<1x128xf32>
    %c0_15 = arith.constant 0 : index
    %c0_16 = arith.constant 0 : index
    %22 = vector.load %arg7[%c0_15, %c0_16] : memref<1x1xf32, #tpu.memory_space<vmem>>, vector<1x1xf32>
    %23 = vector.broadcast %22 : vector<1x1xf32> to vector<1x128xf32>
    %24 = arith.addf %21, %23 : vector<1x128xf32>
    %c0_17 = arith.constant 0 : index
    %c0_18 = arith.constant 0 : index
    %25 = vector.load %arg8[%c0_17, %c0_18] : memref<1x128xf32, #tpu.memory_space<vmem>>, vector<1x128xf32>
    tpu.vector_store %arg8[%c0_17, %c0_18], %24 {strides = array<i32>} : memref<1x128xf32, #tpu.memory_space<vmem>>, vector<1x128xf32>,
    return
  }
  func.func @transform_0(%arg0: i32) -> (i32, i32) {
    %c0_i32 = arith.constant 0 : i32
    %c0_i32_0 = arith.constant 0 : i32
    return %arg0, %c0_i32 : i32, i32
  }
  func.func @transform_1(%arg0: i32) -> (i32, i32) {
    %c0_i32 = arith.constant 0 : i32
    %c0_i32_0 = arith.constant 0 : i32
    %c0_i32_1 = arith.constant 0 : i32
    return %c0_i32, %c0_i32_0 : i32, i32
  }
  func.func @transform_2(%arg0: i32) -> (i32, i32) {
    %c0_i32 = arith.constant 0 : i32
    %c0_i32_0 = arith.constant 0 : i32
    %c0_i32_1 = arith.constant 0 : i32
    return %c0_i32, %c0_i32_0 : i32, i32
  }
  func.func @transform_3(%arg0: i32) -> (i32, i32) {
    %c0_i32 = arith.constant 0 : i32
    %c0_i32_0 = arith.constant 0 : i32
    %c0_i32_1 = arith.constant 0 : i32
    return %c0_i32, %c0_i32_0 : i32, i32
  }
  func.func @transform_4(%arg0: i32) -> (i32, i32) {
    %c0_i32 = arith.constant 0 : i32
    %c0_i32_0 = arith.constant 0 : i32
    %c0_i32_1 = arith.constant 0 : i32
    return %c0_i32, %c0_i32_0 : i32, i32
  }
  func.func @transform_5(%arg0: i32) -> (i32, i32) {
    %c0_i32 = arith.constant 0 : i32
    %c0_i32_0 = arith.constant 0 : i32
    %c0_i32_1 = arith.constant 0 : i32
    return %c0_i32, %c0_i32_0 : i32, i32
  }
  func.func @transform_6(%arg0: i32) -> (i32, i32) {
    %c0_i32 = arith.constant 0 : i32
    %c0_i32_0 = arith.constant 0 : i32
    %c0_i32_1 = arith.constant 0 : i32
    return %c0_i32, %c0_i32_0 : i32, i32
  }
  func.func @transform_7(%arg0: i32) -> (i32, i32) {
    %c0_i32 = arith.constant 0 : i32
    %c0_i32_0 = arith.constant 0 : i32
    return %c0_i32, %arg0 : i32, i32
  }
}

</mosaic_0001>

<bundles_post_ra>
// kernel: tpu_custom_call.1
= control target key start
LH: loop header
LB: loop body
LE: loop exit
PB: predicated region body
PF: predicated region fallthrough
CT: control target
= control target key end

     0   :  { %s933_s0 = inlined_call_operand.vmem [shape: f32[256,32], index: 0, kind: input, shape index: {}]   ;;  %s934_s1 = inlined_call_operand.vmem [shape: bf16[32,32], index: 1, kind: input, shape index: {}]   ;;  %s935_s2 = inlined_call_operand.vmem [shape: f32[32,1], index: 2, kind: input, shape index: {}]   ;;  %s936_s3 = inlined_call_operand.vmem [shape: bf16[32,32], index: 3, kind: input, shape index: {}]   ;;  %s937_s4 = inlined_call_operand.vmem [shape: f32[32,1], index: 4, kind: input, shape index: {}]   ;;  %s938_s5 = inlined_call_operand.vmem [shape: f32[32,1], index: 5, kind: input, shape index: {}]   ;;  %s939_s6 = inlined_call_operand.<no memory space> [shape: f32[1,1], index: 6, kind: input, shape index: {}]   ;;  %s940_s7 = inlined_call_operand.hbm [shape: f32[1,256], index: 7, kind: output, shape index: {}]  }
   0x1   :  { %v12_v0 = vstv %s939_s6 }
   0x2   :  { %13 = vst [vmem:[#allocation2] sm:$0x1] %v12_v0 }
   0x3   :  { %14 = vsyncpa [#allocation4], 0 }
   0x4   :  { %16 = vsyncpa [#allocation4 + $0x1], 0  ;;  %s771_s26 = smov 0   ;;  %s773_s27 = smov 0  }
   0x5   :  { %s775_s28 = smov 0   ;;  %s777_s29 = smov 0  }
   0x6 LB: > { %s792_s6 = sadd.s32 4294967295, %s725_s29   ;;  %s580_s30 = sadd.s32 4294967294, %s725_s29   ;;  %s725_s29 = sphi %s777_s29, %s946_s29   ;;  %s721_s28 = sphi %s775_s28, %s945_s28   ;;  %s717_s27 = sphi %s773_s27, %s944_s27   ;;  %s713_s26 = sphi %s771_s26, %s943_s26  }
   0x7   : > { %s796_s8 = sadd.s32 1, %s725_s29   ;;  %s181_s9 = sadd.s32 1, %s721_s28 }
   0x8   : > { %s178_s10 = ssub.s32 %s725_s29, %s796_s8  ;;  %p191_p0 = scmp.ne.s32.totalorder %s721_s28, %s717_s27 }
   0x9   : > { %p179_p1 = scmp.eq.s32.totalorder %s178_s10, 0  ;;  %p192_p2 = scmp.eq.s32.totalorder %s792_s6, 1 }
   0xa   : > { %p197_p3 = scmp.ne.s32.totalorder %s717_s27, %s713_s26  ;;  %p198_p4 = scmp.eq.s32.totalorder %s580_s30, 1 }
   0xb   : > { %s807_s11 = scalar_select %p179_p1, %s721_s28, %s181_s9  }
   0xc   : > { %p809_p5 = por %p192_p2, %p191_p0  ;;  %p813_p6 = por %p198_p4, %p197_p3 }
   0xd   : > { %p583_p7 = scmp.ge.s32.totalorder %s725_s29, 1  ;;  %p243_p8 = scmp.lt.s32.totalorder %s725_s29, 3 }
   0xf   : > { %p244_p9 = pnand %p583_p7, %p243_p8 }
  0x10   : > { %s584_s14 = sshll.u32 (!%p244_p9), %s792_s6, 4  ;;  %s272_s22 = sand.u32 (!%p244_p9), 1, %s717_s27  }
  0x11   : > { %247 = sbr.rel (%p244_p9) target bundleno = 420 (0x1a4), region = 48  ;;  %p275_p10 = scmp.lt.s32.totalorder (!%p244_p9), %s584_s14, 31 }
  0x12   : > { %s521_s24 = scalar_lea.hbm (!%p244_p9), %s940_s7, %s792_s6  ;;  %s273_s25 = scalar_lea.vmem (!%p244_p9), [#allocation3], %s272_s22 }
  0x13   : > { %s523_s30 = sshll.u32 (!%p244_p9), %s273_s25, 4  ;;  %s525_s9 = sshll.u32 (!%p244_p9), %s521_s24, 4  ;;  %s524_s30 = int_to_ptr.vmem [resolvable:$true] %s523_s30  ;;  %s526_s9 = int_to_ptr.hbm [resolvable:$true] %s525_s9 }
  0x14   : > { %s513_s10 = scalar_lea.sflag (!%p244_p9), [#allocation4], %s272_s22  ;;  %s683_s17 = scalar_lea.hbm (!%p244_p9), %s940_s7, 2 }
  0x16   : > { %s948_s14 = smov (!%p275_p10, %s584_s14), 31  ;;  %vm343_vm0 = vcmask 261120   ;;  %v311_v11 = vld [vmem:[%s935_s2 + $0x10] sm:$0xff]  ;;  %v727_v13 = vmov 0   ;;  %v312_v17 = vld [vmem:[%s935_s2 + $0x18] sm:$0xff]  ;;  %v309_v22 = vld [vmem:[%s935_s2] sm:$0xff] }
  0x17   : > { %s585_s15 = sshll.u32 %s948_s14, 3  ;;  %660 = vset.pattern.permute.xlu0 %v727_v13  ;;  %661 = vset.pattern.permute.xlu1 %v727_v13  ;;  %v405_v27 = vld [vmem:[%s937_s4 + $0x10] sm:$0xff]  ;;  %v310_v28 = vld [vmem:[%s935_s2 + $0x8] sm:$0xff]  ;;  %v406_v34 = vld [vmem:[%s937_s4 + $0x18] sm:$0xff]  ;;  %s677_s14 = sshra.s32 %s526_s9, 4  ;;  %s678_s14 = int_to_ptr.hbm [resolvable:$true] %s677_s14 }
  0x18   : > { %s823_s18 = scalar_lea.vmem %s933_s0, %s585_s15  ;;  %325 = vperm.xlu0 %660, %v311_v11   ;;  %662 = vset.pattern.permute.xlu2 %v727_v13  ;;  %v467_v33 = vld [vmem:[%s938_s5 + $0x8] sm:$0xff]  ;;  %v503_v39 = vld [vmem:[#allocation2] sm:$0x1]  ;;  %v468_v40 = vld [vmem:[%s938_s5 + $0x10] sm:$0xff]  ;;  %s679_s15 = scalar_lea.hbm %s678_s14, 1 }
  0x19   : > { %v295_v1 = vld [vmem:[%s823_s18 + $0x70] sm:$0xff]  ;;  %v296_v2 = vld [vmem:[%s823_s18 + $0x78] sm:$0xff]  ;;  %v293_v4 = vld [vmem:[%s823_s18 + $0x60] sm:$0xff]  ;;  %315 = vperm.xlu1 %661, %v309_v22   ;;  %p680_p11 = scmp.ne.s32.totalorder %s678_s14, %s679_s15  ;;  %p684_p0 = scmp.lt.s32.totalorder %s678_s14, %s940_s7 }
  0x1a   : > { %v304_v3 = vpack.c.bf16 %v296_v2, %v295_v1  ;;  %v294_v5 = vld [vmem:[%s823_s18 + $0x68] sm:$0xff]  ;;  %v291_v9 = vld [vmem:[%s823_s18 + $0x50] sm:$0xff]  ;;  %v292_v10 = vld [vmem:[%s823_s18 + $0x58] sm:$0xff]  ;;  %p685_p1 = scmp.lt.s32.totalorder %s683_s17, %s679_s15 }
  0x1b   : > { %v303_v7 = vpack.c.bf16 %v294_v5, %v293_v4  ;;  %v302_v12 = vpack.c.bf16 %v292_v10, %v291_v9  ;;  %v289_v15 = vld [vmem:[%s823_s18 + $0x40] sm:$0xff]  ;;  %v290_v16 = vld [vmem:[%s823_s18 + $0x48] sm:$0xff]  ;;  %v287_v20 = vld [vmem:[%s823_s18 + $0x30] sm:$0xff]  ;;  %p681_p12 = pnand %p680_p11, %p809_p5 }
  0x1c   : > { %v372_v6 = vsel %vm343_vm0, %v304_v3, 0  ;;  %v301_v18 = vpack.c.bf16 %v290_v16, %v289_v15  ;;  %v288_v21 = vld [vmem:[%s823_s18 + $0x38] sm:$0xff]  ;;  %v285_v25 = vld [vmem:[%s823_s18 + $0x20] sm:$0xff]  ;;  %v286_v26 = vld [vmem:[%s823_s18 + $0x28] sm:$0xff]  ;;  %p686_p2 = por %p685_p1, %p684_p0 }
  0x1d   : > { %612 = vmatpush.bf16.xpose.msra.mxu2 %v372_v6  ;;  %374 = vmatpush.bf16.xpose.msra.mxu0 %v372_v6  ;;  %v369_v8 = vsel %vm343_vm0, %v303_v7, 0  ;;  %v366_v14 = vsel %vm343_vm0, %v302_v12, 0  ;;  %v300_v23 = vpack.c.bf16 %v288_v21, %v287_v20  ;;  %v299_v29 = vpack.c.bf16 %v286_v26, %v285_v25  ;;  %v283_v31 = vld [vmem:[%s823_s18 + $0x10] sm:$0xff]  ;;  %v284_v32 = vld [vmem:[%s823_s18 + $0x18] sm:$0xff]  ;;  %v281_v37 = vld [vmem:[%s823_s18] sm:$0xff]  ;;  %p682_p13 = pneg %p681_p12 }
  0x1e   : > { %v363_v19 = vsel %vm343_vm0, %v301_v18, 0  ;;  %v298_v35 = vpack.c.bf16 %v284_v32, %v283_v31  ;;  %v282_v38 = vld [vmem:[%s823_s18 + $0x8] sm:$0xff]  ;;  %v608_v44 = vld [vmem:[%s934_s1] sm:$0xff]  ;;  %v469_v3 = vld [vmem:[%s938_s5 + $0x18] sm:$0xff] }
  0x1f   : > { %v360_v24 = vsel %vm343_vm0, %v300_v23, 0  ;;  %v357_v30 = vsel %vm343_vm0, %v299_v29, 0  ;;  %v297_v41 = vpack.c.bf16 %v282_v38, %v281_v37  ;;  %v609_v43 = vld [vmem:[%s934_s1 + $0x8] sm:$0xff]  ;;  %v403_v45 = vld [vmem:[%s937_s4] sm:$0xff]  ;;  %p687_p3 = pnand %p686_p2, %p682_p13 }
  0x20   : > { %330 = vperm.xlu0 %660, %v312_v17   ;;  %v354_v36 = vsel %vm343_vm0, %v298_v35, 0  ;;  %409 = vperm.xlu2 %662, %v403_v45   ;;  %v404_v51 = vld [vmem:[%s937_s4 + $0x8] sm:$0xff]  ;;  %v466_v61 = vld [vmem:[%s938_s5] sm:$0xff] }
  0x21   : > { %320 = vperm.xlu1 %661, %v310_v28   ;;  %v351_v42 = vsel %vm343_vm0, %v297_v41, 0  ;;  %v610_v2 = vld [vmem:[%s936_s3] sm:$0xff]  ;;  %v611_v4 = vld [vmem:[%s936_s3 + $0x8] sm:$0xff] }
  0x25   : > { %613 = vmatpush.bf16.xpose.msra.mxu2 %v369_v8  ;;  %375 = vmatpush.bf16.xpose.msra.mxu0 %v369_v8 }
  0x28   : > { %419 = vperm.xlu0 %660, %v405_v27   ;;  %414 = vperm.xlu2 %662, %v404_v51  }
  0x29   : > { %424 = vperm.xlu1 %661, %v406_v34  }
  0x2d   : > { %614 = vmatpush.bf16.xpose.msra.mxu2 %v366_v14  ;;  %376 = vmatpush.bf16.xpose.msra.mxu0 %v366_v14 }
  0x30   : > { %477 = vperm.xlu0 %660, %v467_v33   ;;  %472 = vperm.xlu2 %662, %v466_v61  }
  0x31   : > { %482 = vperm.xlu1 %661, %v468_v40  }
  0x35   : > { %615 = vmatpush.bf16.xpose.msra.mxu2 %v363_v19  ;;  %377 = vmatpush.bf16.xpose.msra.mxu0 %v363_v19 }
  0x38   : > { %506 = vperm.xlu0 %660, %v503_v39   ;;  %487 = vperm.xlu2 %662, %v469_v3  }
  0x3d   : > { %616 = vmatpush.bf16.xpose.msra.mxu2 %v360_v24  ;;  %378 = vmatpush.bf16.xpose.msra.mxu0 %v360_v24 }
  0x45   : > { %617 = vmatpush.bf16.xpose.msra.mxu2 %v357_v30  ;;  %379 = vmatpush.bf16.xpose.msra.mxu0 %v357_v30 }
  0x4d   : > { %618 = vmatpush.bf16.xpose.msra.mxu2 %v354_v36  ;;  %380 = vmatpush.bf16.xpose.msra.mxu0 %v354_v36 }
  0x55   : > { %619 = vmatpush.bf16.xpose.msra.mxu2 %v351_v42  ;;  %381 = vmatpush.bf16.xpose.msra.mxu0 %v351_v42 }
  0x5c   : > { %595 = vmatmul.msk.bf16.vlgmr.msra.gmra.mxu2 %vm343_vm0, %v609_v43  ;;  %594 = vmatmul.msk.bf16.vlgmr.msra.gmra.mxu0 %vm343_vm0, %v608_v44 }
  0x7a   : > { %v410_v5 = vpop.permute.xlu2 %409 }
  0x82   : > { %v415_v7 = vpop.permute.xlu2 %414 }
  0x8a   : > { %v326_v47 = vpop.permute.xlu0 %325  ;;  %v473_v15 = vpop.permute.xlu2 %472 }
  0x8b   : > { %v316_v48 = vpop.permute.xlu1 %315 }
  0x92   : > { %v331_v52 = vpop.permute.xlu0 %330  ;;  %v488_v28 = vpop.permute.xlu2 %487 }
  0x93   : > { %v321_v54 = vpop.permute.xlu1 %320 }
  0x9a   : > { %v420_v9 = vpop.permute.xlu0 %419 }
  0x9b   : > { %v425_v10 = vpop.permute.xlu1 %424 }
  0xa2   : > { %v478_v19 = vpop.permute.xlu0 %477 }
  0xa3   : > { %v483_v21 = vpop.permute.xlu1 %482 }
  0xaa   : > { %v507_v36 = vpop.permute.xlu0 %506 }
  0xab   : > { %v509_v38 = vperm.slane %v507_v36, 0 }
  0xd9   : > { %v383_v46 = vpop.f32.mrf.mxu0 }
  0xda   : > { %v384_v56 = vadd.f32 %v383_v46, %v316_v48 }
  0xdc   : > { %v393_v62 = vmax.f32 %v384_v56, 0.0 }
  0xdf   : > { %v388_v49 = vpop.f32.mrf.mxu2 }
  0xe0   : > { %v389_v53 = vadd.f32 %v388_v49, %v326_v47 }
  0xe1   : > { %v385_v50 = vpop.f32.mrf.mxu0 }
  0xe2   : > { %v386_v57 = vadd.f32 %v385_v50, %v321_v54  ;;  %v395_v59 = vmax.f32 %v389_v53, 0.0 }
  0xe4   : > { %v394_v63 = vmax.f32 %v386_v57, 0.0 }
  0xe6   : > { %v401_v1 = vpack.c.bf16 %v394_v63, %v393_v62 }
  0xe7   : > { %v390_v55 = vpop.f32.mrf.mxu2 }
  0xe8   : > { %v391_v58 = vadd.f32 %v390_v55, %v331_v52 }
  0xea   : > { %v396_v60 = vmax.f32 %v391_v58, 0.0 }
  0xec   : > { %v402_v0 = vpack.c.bf16 %v396_v60, %v395_v59 }
  0xee   : > { %449 = vmatpush.bf16.msra.mxu1 %v402_v0 }
  0xf2   : > { %450 = vmatpush.bf16.msra.mxu1 %v401_v1 }
  0xf5   : > { %604 = vmatmul.msk.bf16.vlgmr.msra.gmra.mxu1 %vm343_vm0, %v610_v2 }
 0x105   : > { %605 = vmatmul.msk.bf16.gmra.mxu1 %vm343_vm0, %v611_v4 }
 0x172   : > { %v452_v6 = vpop.f32.mrf.mxu1 }
 0x173   : > { %v453_v13 = vadd.f32 %v452_v6, %v410_v5 }
 0x175   : > { %v462_v17 = vmax.f32 %v453_v13, 0.0 }
 0x177   : > { %v490_v23 = vmul.f32 %v473_v15, %v462_v17 }
 0x17a   : > { %v454_v8 = vpop.f32.mrf.mxu1 }
 0x17b   : > { %v455_v11 = vadd.f32 %v454_v8, %v415_v7 }
 0x17d   : > { %v463_v16 = vmax.f32 %v455_v11, 0.0 }
 0x17f   : > { %v491_v20 = vmul.f32 %v478_v19, %v463_v16 }
 0x181   : > { %v494_v26 = vadd.f32 %v491_v20, %v490_v23 }
 0x182   : > { %v457_v12 = vpop.f32.mrf.mxu1 }
 0x183   : > { %v458_v14 = vadd.f32 %v457_v12, %v420_v9 }
 0x185   : > { %v464_v18 = vmax.f32 %v458_v14, 0.0 }
 0x187   : > { %v492_v24 = vmul.f32 %v483_v21, %v464_v18 }
 0x189   : > { %v495_v29 = vadd.f32 %v494_v26, %v492_v24 }
 0x18a   : > { %v459_v22 = vpop.f32.mrf.mxu1 }
 0x18b   : > { %v460_v25 = vadd.f32 %v459_v22, %v425_v10 }
 0x18d   : > { %v465_v27 = vmax.f32 %v460_v25, 0.0 }
 0x18f   : > { %v493_v30 = vmul.f32 %v488_v28, %v465_v27 }
 0x191   : > { %v496_v31 = vadd.f32 %v495_v29, %v493_v30 }
 0x193   : > { %v497_v32 = vrot.slane %v496_v31, 4 }
 0x195   : > { %v498_v33 = vadd.f32 %v497_v32, %v496_v31 }
 0x197   : > { %v499_v34 = vrot.slane %v498_v33, 2 }
 0x199   : > { %v500_v35 = vadd.f32 %v499_v34, %v498_v33 }
 0x19b   : > { %v501_v37 = vrot.slane %v500_v35, 1 }
 0x19d   : > { %v502_v39 = vadd.f32 %v501_v37, %v500_v35 }
 0x19f   : > { %v510_v40 = vadd.f32 %v509_v38, %v502_v39 }
 0x1a1   : > { %511 = vst [vmem:[%s273_s25] sm:$0x1] %v510_v40 }
 0x1a2   : > { %690 = shalt.err (!%p687_p3)
}
 0x1a3   : > { %620 = dma.vmem_to_hbm [thread:$0]  (%p809_p5), %s524_s30, 16, %s526_s9, %s513_s10  }
 0x1a4 PF: > { %p626_p4 = scmp.ge.s32.totalorder %s725_s29, 2  ;;  %s537_s21 = sand.u32 1, %s713_s26  }
 0x1a5   : > { %s538_s22 = scalar_lea.sflag [#allocation4], %s537_s21 }
 0x1a6   : > { %p623_p7 = pnand %p626_p4, %p813_p6 }
 0x1a8   : > { %p624_p8 = pneg %p623_p7 }
 0x1aa   : > { %708 = dma.done.wait (%p624_p8), %s538_s22, 16  }
 0x1ab   : > { %710 = vsyncadd (%p624_p8), %s538_s22, 4294967280  ;;  %p19_p9 = scmp.ge.s32.totalorder %s796_s8, 4   ;;  %s943_s26 = smov %s717_s27 }
 0x1ac   : > { %s944_s27 = smov %s721_s28  ;;  %s945_s28 = smov %s807_s11 }
 0x1ad   : > { %s946_s29 = smov %s796_s8  ;;  %21 = sbr.rel (!%p19_p9) target bundleno = 6 (0x6), region = 83 }
 0x1b2   :  { %543 = vsyncpa [#allocation4], 1 }
 0x1b3   :  { %545 = vsyncpa [#allocation4 + $0x1], 1 }

</bundles_post_ra>
